<compile_context>
chip_gen: v7x
topology: tpu7x:2x2x1
jax: 0.10.0
libtpu: 0.0.40
codegen_flags: <defaults>
</compile_context>

<pallas_src>
import numpy as np
import jax
import jax.numpy as jnp
from jax import lax
from jax.experimental import pallas as pl
from jax.experimental.pallas import tpu as pltpu


def _round_up(n, m):
    return ((n + m - 1) // m) * m


def _make_recurrent_kernel(seq_len, tt):
    """h <- tanh(x_t @ W_in.T + h @ W_res.T), tt timesteps per grid step."""
    needs_mask = (seq_len % tt) != 0

    def kernel(x_ref, wit_ref, wrt_ref, o_ref, h_ref):
        # x_ref:   (TT, BB, Ip)  raw input block, time-leading layout
        # wit_ref: (Ip, Hp)      W_in.T,  resident (constant index_map)
        # wrt_ref: (Hp, Hp)      W_res.T, resident (constant index_map)
        # o_ref:   (BB, Hp)      final hidden state for this batch tile
        # h_ref:   (BB, Hp)      hidden-state scratch, persists across t blocks
        tb = pl.program_id(1)

        @pl.when(tb == 0)
        def _():
            h_ref[...] = jnp.zeros_like(h_ref)

        # Load the resident weights once per grid step (hoisted out of the loop).
        wit = wit_ref[...]
        wrt = wrt_ref[...]
        cdt = wrt.dtype  # compute dtype for MXU operands (f32 or bf16)

        def step(i, h):
            x_t = x_ref[i]                                        # (BB, Ip), leading-axis index: no relayout
            u_t = jnp.dot(x_t.astype(cdt), wit,
                          preferred_element_type=jnp.float32)     # fused input projection
            r_t = jnp.dot(h.astype(cdt), wrt,
                          preferred_element_type=jnp.float32)     # recurrent projection
            h_new = jnp.tanh(u_t + r_t)
            if needs_mask:
                # Padded timesteps (t >= seq_len) must not update the state.
                h_new = jnp.where(tb * tt + i < seq_len, h_new, h)
            return h_new

        # Bounded unroll: enough straight-line MXU/EUP work for the scheduler
        # without blowing the 64-vreg file when TT is large.
        h = lax.fori_loop(0, tt, step, h_ref[...], unroll=min(tt, 8))
        h_ref[...] = h

        @pl.when(tb == pl.num_programs(1) - 1)
        def _():
            o_ref[...] = h_ref[...].astype(o_ref.dtype)

    return kernel


def esn_forward(x, w_in, w_res, *, tt_max=32, weight_dtype=jnp.float32):
    """x: (B, T, I) f32, w_in: (H, I), w_res: (H, H). Returns h: (B, H) f32.

    weight_dtype=jnp.bfloat16 halves resident-weight VMEM and MXU passes
    (recommended for large H on v6e/v7x); accumulation stays f32 either way.
    """
    B, T, I = x.shape
    H = w_in.shape[0]

    # ---- Hardware-friendly padded sizes. ----
    Hp = _round_up(H, 128)                    # lane dim: full vregs, unmasked stores
    Ip = _round_up(I, 128)                    # contraction dim of the input projection
    Bp = _round_up(B, 8)                      # sublane dim
    if Bp > 256:
        # 256 rows fill the M dimension of the 256x256 MXU on v6e/v7x.
        Bp = _round_up(B, 256)
        BB = 256
    else:
        BB = Bp
    TT = min(_round_up(T, 8), _round_up(tt_max, 8))   # timesteps per grid step
    Tp = _round_up(T, TT)

    # ---- Time-leading input layout (per-timestep read = leading-axis index). ----
    x_tbi = jnp.transpose(x, (1, 0, 2))                              # (T, B, I)
    x_p = jnp.pad(x_tbi, ((0, Tp - T), (0, Bp - B), (0, Ip - I)))    # (Tp, Bp, Ip)

    # ---- Pad the (tiny) weights once; zero rows/cols keep padded hidden units
    #      at tanh(0)=0 so they never contaminate real units. ----
    w_in_t = jnp.pad(w_in.T, ((0, Ip - I), (0, Hp - H))).astype(weight_dtype)    # (Ip, Hp)
    w_res_t = jnp.pad(w_res.T, ((0, Hp - H), (0, Hp - H))).astype(weight_dtype)  # (Hp, Hp)

    nb, nt = Bp // BB, Tp // TT

    # ---- VMEM budget (double-buffered x block, single-buffered weights). ----
    wbytes = np.dtype(weight_dtype).itemsize
    vmem_need = (2 * TT * BB * Ip * 4                 # x blocks (2 pipeline buffers)
                 + (Ip * Hp + Hp * Hp) * wbytes       # resident weights (single-buffered)
                 + 2 * BB * Hp * 4                    # output block
                 + BB * Hp * 4)                       # h scratch
    vmem_limit = None
    if vmem_need > 16 * 1024 * 1024:                  # v5e default scoped limit (smallest)
        try:
            vmem_cap = pltpu.get_tpu_info().vmem_capacity_bytes
        except Exception:
            vmem_cap = 64 * 1024 * 1024               # v7x per-TC VMEM (smallest of the fleet)
        vmem_limit = int(min(vmem_need * 1.2, vmem_cap * 0.85))   # never exceed physical VMEM

    # Single-buffer the resident weights: constant index_map => re-fetching /
    # double-buffering them is pure VMEM waste.
    weight_spec_kwargs = {}
    if hasattr(pl, "Buffered"):
        weight_spec_kwargs = dict(pipeline_mode=pl.Buffered(1))

    cost = pl.CostEstimate(
        flops=2 * B * T * H * (H + I),
        transcendentals=B * T * H,
        bytes_accessed=int(x_p.size * 4 + w_in_t.size * wbytes
                           + w_res_t.size * wbytes + Bp * Hp * 4),
    )

    out = pl.pallas_call(
        _make_recurrent_kernel(T, TT),
        out_shape=jax.ShapeDtypeStruct((Bp, Hp), jnp.float32),
        grid_spec=pltpu.PrefetchScalarGridSpec(
            num_scalar_prefetch=0,
            grid=(nb, nt),
            in_specs=[
                pl.BlockSpec((TT, BB, Ip), lambda b, t: (t, b, 0)),
                pl.BlockSpec((Ip, Hp), lambda b, t: (0, 0), **weight_spec_kwargs),
                pl.BlockSpec((Hp, Hp), lambda b, t: (0, 0), **weight_spec_kwargs),
            ],
            out_specs=pl.BlockSpec((BB, Hp), lambda b, t: (b, 0)),
            scratch_shapes=[pltpu.VMEM((BB, Hp), jnp.float32)],
        ),
        compiler_params=pltpu.CompilerParams(
            # Batch tiles are independent (megacore-shardable); the time axis
            # carries the recurrence and must stay sequential.
            dimension_semantics=("parallel", "arbitrary"),
            vmem_limit_bytes=vmem_limit,
        ),
        cost_estimate=cost,
    )(x_p, w_in_t, w_res_t)

    return out[:B, :H]


def esn_reference(x, w_in, w_res):
    """Pure-NumPy f32 reference (avoids TPU default-precision matmuls)."""
    x = np.asarray(x, np.float32)
    w_in = np.asarray(w_in, np.float32)
    w_res = np.asarray(w_res, np.float32)
    B, T, I = x.shape
    H = w_in.shape[0]
    h = np.zeros((B, H), np.float32)
    for t in range(T):
        h = np.tanh(x[:, t, :] @ w_in.T + h @ w_res.T)
    return h


def make_esn_params(input_size, hidden_size, sparsity=0.1, spectral_radius=0.95):
    """Deterministic synthetic init mirroring the PyTorch __init__ literally
    (zeroes entries where rand < sparsity, then rescales to spectral_radius).
    Note: the eigvals-based rescale is parameter construction (host-side), not
    part of the forward pass."""
    rng = np.random.default_rng(0)
    w_in = rng.standard_normal((hidden_size, input_size)).astype(np.float32)
    w_res = rng.standard_normal((hidden_size, hidden_size)).astype(np.float32)
    mask = rng.random((hidden_size, hidden_size)) < sparsity
    w_res = np.where(mask, np.zeros_like(w_res), w_res)
    radius = np.max(np.abs(np.linalg.eigvals(w_res))).real
    w_res = (w_res * (spectral_radius / radius)).astype(np.float32)
    return jnp.asarray(w_in), jnp.asarray(w_res)


if __name__ == "__main__":
    B, T, I, H = 2, 8, 16, 32  # batch, seq_len, input_size, hidden_size

    key = jax.random.PRNGKey(0)
    x = jax.random.normal(key, (B, T, I), dtype=jnp.float32)
    w_in, w_res = make_esn_params(I, H)

    esn = jax.jit(esn_forward)
    h = jax.block_until_ready(esn(x, w_in, w_res))

    h_ref = esn_reference(x, w_in, w_res)
    np.testing.assert_allclose(np.asarray(h), h_ref, rtol=1e-4, atol=1e-4)

    print("KERNEL_OK")
</pallas_src>

<mosaic_0001>
module attributes {stable_mosaic.version = 11 : i64} {
  func.func @kernel(%arg0: i32, %arg1: i32, %arg2: memref<8x8x128xf32, #tpu.memory_space<vmem>>, %arg3: memref<128x128xf32, #tpu.memory_space<vmem>>, %arg4: memref<128x128xf32, #tpu.memory_space<vmem>>, %arg5: memref<8x128xf32, #tpu.memory_space<vmem>>, %arg6: memref<8x128xf32, #tpu.memory_space<vmem>>) attributes {dimension_semantics = [#tpu.dimension_semantics<parallel>, #tpu.dimension_semantics<arbitrary>], iteration_bounds = array<i64: 1, 1>, scalar_prefetch = 0 : i64, scratch_operands = 1 : i64, tpu.core_type = #tpu.core_type<tc>, window_params = [{transform_indices = @transform_0, window_bounds = array<i64: 8, 8, 128>}, {pipeline_mode = #tpu.pipeline_mode<synchronous>, transform_indices = @transform_1, window_bounds = array<i64: 128, 128>}, {pipeline_mode = #tpu.pipeline_mode<synchronous>, transform_indices = @transform_2, window_bounds = array<i64: 128, 128>}, {transform_indices = @transform_3, window_bounds = array<i64: 8, 128>}]} {
    %c0_i32 = arith.constant 0 : i32
    %0 = arith.cmpi eq, %arg1, %c0_i32 : i32
    %1 = arith.extui %0 : i1 to i32
    %c0_i32_0 = arith.constant 0 : i32
    %2 = arith.cmpi ne, %1, %c0_i32_0 : i32
    scf.if %2 {
      %cst_42 = arith.constant 0.000000e+00 : f32
      %66 = vector.broadcast %cst_42 : f32 to vector<8x128xf32>
      %c0_43 = arith.constant 0 : index
      %c0_44 = arith.constant 0 : index
      %67 = vector.load %arg6[%c0_43, %c0_44] : memref<8x128xf32, #tpu.memory_space<vmem>>, vector<8x128xf32>
      tpu.vector_store %arg6[%c0_43, %c0_44], %66 {strides = array<i32>} : memref<8x128xf32, #tpu.memory_space<vmem>>, vector<8x128xf32>,
    } else {
    }
    %c0 = arith.constant 0 : index
    %c0_1 = arith.constant 0 : index
    %3 = vector.load %arg3[%c0, %c0_1] : memref<128x128xf32, #tpu.memory_space<vmem>>, vector<128x128xf32>
    %c0_2 = arith.constant 0 : index
    %c0_3 = arith.constant 0 : index
    %4 = vector.load %arg4[%c0_2, %c0_3] : memref<128x128xf32, #tpu.memory_space<vmem>>, vector<128x128xf32>
    %c0_4 = arith.constant 0 : index
    %c0_5 = arith.constant 0 : index
    %5 = vector.load %arg6[%c0_4, %c0_5] : memref<8x128xf32, #tpu.memory_space<vmem>>, vector<8x128xf32>
    %c0_i32_6 = arith.constant 0 : i32
    %6 = arith.index_cast %c0_i32_6 : i32 to index
    %c0_7 = arith.constant 0 : index
    %c0_8 = arith.constant 0 : index
    %7 = vector.load %arg2[%6, %c0_7, %c0_8] : memref<8x8x128xf32, #tpu.memory_space<vmem>>, vector<1x8x128xf32>
    %8 = vector.shape_cast %7 : vector<1x8x128xf32> to vector<8x128xf32>
    %cst = arith.constant dense<0.000000e+00> : vector<8x128xf32>
    %9 = tpu.matmul %8, %3, %cst {dimension_numbers = #tpu.dot_dimension_numbers<[1], [0], [0], [1], [0, 0, 1, 1], [], []>} : vector<8x128xf32>, vector<128x128xf32>, vector<8x128xf32> -> vector<8x128xf32>
    %cst_9 = arith.constant dense<0.000000e+00> : vector<8x128xf32>
    %10 = tpu.matmul %5, %4, %cst_9 {dimension_numbers = #tpu.dot_dimension_numbers<[1], [0], [0], [1], [0, 0, 1, 1], [], []>} : vector<8x128xf32>, vector<128x128xf32>, vector<8x128xf32> -> vector<8x128xf32>
    %11 = arith.addf %9, %10 : vector<8x128xf32>
    %12 = math.tanh %11 : vector<8x128xf32>
    %c1_i32 = arith.constant 1 : i32
    %13 = arith.index_cast %c1_i32 : i32 to index
    %c0_10 = arith.constant 0 : index
    %c0_11 = arith.constant 0 : index
    %14 = vector.load %arg2[%13, %c0_10, %c0_11] : memref<8x8x128xf32, #tpu.memory_space<vmem>>, vector<1x8x128xf32>
    %15 = vector.shape_cast %14 : vector<1x8x128xf32> to vector<8x128xf32>
    %cst_12 = arith.constant dense<0.000000e+00> : vector<8x128xf32>
    %16 = tpu.matmul %15, %3, %cst_12 {dimension_numbers = #tpu.dot_dimension_numbers<[1], [0], [0], [1], [0, 0, 1, 1], [], []>} : vector<8x128xf32>, vector<128x128xf32>, vector<8x128xf32> -> vector<8x128xf32>
    %cst_13 = arith.constant dense<0.000000e+00> : vector<8x128xf32>
    %17 = tpu.matmul %12, %4, %cst_13 {dimension_numbers = #tpu.dot_dimension_numbers<[1], [0], [0], [1], [0, 0, 1, 1], [], []>} : vector<8x128xf32>, vector<128x128xf32>, vector<8x128xf32> -> vector<8x128xf32>
    %18 = arith.addf %16, %17 : vector<8x128xf32>
    %19 = math.tanh %18 : vector<8x128xf32>
    %c2_i32 = arith.constant 2 : i32
    %20 = arith.index_cast %c2_i32 : i32 to index
    %c0_14 = arith.constant 0 : index
    %c0_15 = arith.constant 0 : index
    %21 = vector.load %arg2[%20, %c0_14, %c0_15] : memref<8x8x128xf32, #tpu.memory_space<vmem>>, vector<1x8x128xf32>
    %22 = vector.shape_cast %21 : vector<1x8x128xf32> to vector<8x128xf32>
    %cst_16 = arith.constant dense<0.000000e+00> : vector<8x128xf32>
    %23 = tpu.matmul %22, %3, %cst_16 {dimension_numbers = #tpu.dot_dimension_numbers<[1], [0], [0], [1], [0, 0, 1, 1], [], []>} : vector<8x128xf32>, vector<128x128xf32>, vector<8x128xf32> -> vector<8x128xf32>
    %cst_17 = arith.constant dense<0.000000e+00> : vector<8x128xf32>
    %24 = tpu.matmul %19, %4, %cst_17 {dimension_numbers = #tpu.dot_dimension_numbers<[1], [0], [0], [1], [0, 0, 1, 1], [], []>} : vector<8x128xf32>, vector<128x128xf32>, vector<8x128xf32> -> vector<8x128xf32>
    %25 = arith.addf %23, %24 : vector<8x128xf32>
    %26 = math.tanh %25 : vector<8x128xf32>
    %c3_i32 = arith.constant 3 : i32
    %27 = arith.index_cast %c3_i32 : i32 to index
    %c0_18 = arith.constant 0 : index
    %c0_19 = arith.constant 0 : index
    %28 = vector.load %arg2[%27, %c0_18, %c0_19] : memref<8x8x128xf32, #tpu.memory_space<vmem>>, vector<1x8x128xf32>
    %29 = vector.shape_cast %28 : vector<1x8x128xf32> to vector<8x128xf32>
    %cst_20 = arith.constant dense<0.000000e+00> : vector<8x128xf32>
    %30 = tpu.matmul %29, %3, %cst_20 {dimension_numbers = #tpu.dot_dimension_numbers<[1], [0], [0], [1], [0, 0, 1, 1], [], []>} : vector<8x128xf32>, vector<128x128xf32>, vector<8x128xf32> -> vector<8x128xf32>
    %cst_21 = arith.constant dense<0.000000e+00> : vector<8x128xf32>
    %31 = tpu.matmul %26, %4, %cst_21 {dimension_numbers = #tpu.dot_dimension_numbers<[1], [0], [0], [1], [0, 0, 1, 1], [], []>} : vector<8x128xf32>, vector<128x128xf32>, vector<8x128xf32> -> vector<8x128xf32>
    %32 = arith.addf %30, %31 : vector<8x128xf32>
    %33 = math.tanh %32 : vector<8x128xf32>
    %c4_i32 = arith.constant 4 : i32
    %34 = arith.index_cast %c4_i32 : i32 to index
    %c0_22 = arith.constant 0 : index
    %c0_23 = arith.constant 0 : index
    %35 = vector.load %arg2[%34, %c0_22, %c0_23] : memref<8x8x128xf32, #tpu.memory_space<vmem>>, vector<1x8x128xf32>
    %36 = vector.shape_cast %35 : vector<1x8x128xf32> to vector<8x128xf32>
    %cst_24 = arith.constant dense<0.000000e+00> : vector<8x128xf32>
    %37 = tpu.matmul %36, %3, %cst_24 {dimension_numbers = #tpu.dot_dimension_numbers<[1], [0], [0], [1], [0, 0, 1, 1], [], []>} : vector<8x128xf32>, vector<128x128xf32>, vector<8x128xf32> -> vector<8x128xf32>
    %cst_25 = arith.constant dense<0.000000e+00> : vector<8x128xf32>
    %38 = tpu.matmul %33, %4, %cst_25 {dimension_numbers = #tpu.dot_dimension_numbers<[1], [0], [0], [1], [0, 0, 1, 1], [], []>} : vector<8x128xf32>, vector<128x128xf32>, vector<8x128xf32> -> vector<8x128xf32>
    %39 = arith.addf %37, %38 : vector<8x128xf32>
    %40 = math.tanh %39 : vector<8x128xf32>
    %c5_i32 = arith.constant 5 : i32
    %41 = arith.index_cast %c5_i32 : i32 to index
    %c0_26 = arith.constant 0 : index
    %c0_27 = arith.constant 0 : index
    %42 = vector.load %arg2[%41, %c0_26, %c0_27] : memref<8x8x128xf32, #tpu.memory_space<vmem>>, vector<1x8x128xf32>
    %43 = vector.shape_cast %42 : vector<1x8x128xf32> to vector<8x128xf32>
    %cst_28 = arith.constant dense<0.000000e+00> : vector<8x128xf32>
    %44 = tpu.matmul %43, %3, %cst_28 {dimension_numbers = #tpu.dot_dimension_numbers<[1], [0], [0], [1], [0, 0, 1, 1], [], []>} : vector<8x128xf32>, vector<128x128xf32>, vector<8x128xf32> -> vector<8x128xf32>
    %cst_29 = arith.constant dense<0.000000e+00> : vector<8x128xf32>
    %45 = tpu.matmul %40, %4, %cst_29 {dimension_numbers = #tpu.dot_dimension_numbers<[1], [0], [0], [1], [0, 0, 1, 1], [], []>} : vector<8x128xf32>, vector<128x128xf32>, vector<8x128xf32> -> vector<8x128xf32>
    %46 = arith.addf %44, %45 : vector<8x128xf32>
    %47 = math.tanh %46 : vector<8x128xf32>
    %c6_i32 = arith.constant 6 : i32
    %48 = arith.index_cast %c6_i32 : i32 to index
    %c0_30 = arith.constant 0 : index
    %c0_31 = arith.constant 0 : index
    %49 = vector.load %arg2[%48, %c0_30, %c0_31] : memref<8x8x128xf32, #tpu.memory_space<vmem>>, vector<1x8x128xf32>
    %50 = vector.shape_cast %49 : vector<1x8x128xf32> to vector<8x128xf32>
    %cst_32 = arith.constant dense<0.000000e+00> : vector<8x128xf32>
    %51 = tpu.matmul %50, %3, %cst_32 {dimension_numbers = #tpu.dot_dimension_numbers<[1], [0], [0], [1], [0, 0, 1, 1], [], []>} : vector<8x128xf32>, vector<128x128xf32>, vector<8x128xf32> -> vector<8x128xf32>
    %cst_33 = arith.constant dense<0.000000e+00> : vector<8x128xf32>
    %52 = tpu.matmul %47, %4, %cst_33 {dimension_numbers = #tpu.dot_dimension_numbers<[1], [0], [0], [1], [0, 0, 1, 1], [], []>} : vector<8x128xf32>, vector<128x128xf32>, vector<8x128xf32> -> vector<8x128xf32>
    %53 = arith.addf %51, %52 : vector<8x128xf32>
    %54 = math.tanh %53 : vector<8x128xf32>
    %c7_i32 = arith.constant 7 : i32
    %55 = arith.index_cast %c7_i32 : i32 to index
    %c0_34 = arith.constant 0 : index
    %c0_35 = arith.constant 0 : index
    %56 = vector.load %arg2[%55, %c0_34, %c0_35] : memref<8x8x128xf32, #tpu.memory_space<vmem>>, vector<1x8x128xf32>
    %57 = vector.shape_cast %56 : vector<1x8x128xf32> to vector<8x128xf32>
    %cst_36 = arith.constant dense<0.000000e+00> : vector<8x128xf32>
    %58 = tpu.matmul %57, %3, %cst_36 {dimension_numbers = #tpu.dot_dimension_numbers<[1], [0], [0], [1], [0, 0, 1, 1], [], []>} : vector<8x128xf32>, vector<128x128xf32>, vector<8x128xf32> -> vector<8x128xf32>
    %cst_37 = arith.constant dense<0.000000e+00> : vector<8x128xf32>
    %59 = tpu.matmul %54, %4, %cst_37 {dimension_numbers = #tpu.dot_dimension_numbers<[1], [0], [0], [1], [0, 0, 1, 1], [], []>} : vector<8x128xf32>, vector<128x128xf32>, vector<8x128xf32> -> vector<8x128xf32>
    %60 = arith.addf %58, %59 : vector<8x128xf32>
    %61 = math.tanh %60 : vector<8x128xf32>
    %c8_i32 = arith.constant 8 : i32
    %c0_38 = arith.constant 0 : index
    %c0_39 = arith.constant 0 : index
    %62 = vector.load %arg6[%c0_38, %c0_39] : memref<8x128xf32, #tpu.memory_space<vmem>>, vector<8x128xf32>
    tpu.vector_store %arg6[%c0_38, %c0_39], %61 {strides = array<i32>} : memref<8x128xf32, #tpu.memory_space<vmem>>, vector<8x128xf32>,
    %c0_i32_40 = arith.constant 0 : i32
    %63 = arith.cmpi eq, %arg1, %c0_i32_40 : i32
    %64 = arith.extui %63 : i1 to i32
    %c0_i32_41 = arith.constant 0 : i32
    %65 = arith.cmpi ne, %64, %c0_i32_41 : i32
    scf.if %65 {
      %c0_42 = arith.constant 0 : index
      %c0_43 = arith.constant 0 : index
      %66 = vector.load %arg6[%c0_42, %c0_43] : memref<8x128xf32, #tpu.memory_space<vmem>>, vector<8x128xf32>
      %c0_44 = arith.constant 0 : index
      %c0_45 = arith.constant 0 : index
      %67 = vector.load %arg5[%c0_44, %c0_45] : memref<8x128xf32, #tpu.memory_space<vmem>>, vector<8x128xf32>
      tpu.vector_store %arg5[%c0_44, %c0_45], %66 {strides = array<i32>} : memref<8x128xf32, #tpu.memory_space<vmem>>, vector<8x128xf32>,
    } else {
    }
    return
  }
  func.func @transform_0(%arg0: i32, %arg1: i32) -> (i32, i32, i32) {
    %c0_i32 = arith.constant 0 : i32
    %c0_i32_0 = arith.constant 0 : i32
    return %arg1, %arg0, %c0_i32 : i32, i32, i32
  }
  func.func @transform_1(%arg0: i32, %arg1: i32) -> (i32, i32) {
    %c0_i32 = arith.constant 0 : i32
    %c0_i32_0 = arith.constant 0 : i32
    %c0_i32_1 = arith.constant 0 : i32
    return %c0_i32, %c0_i32_0 : i32, i32
  }
  func.func @transform_2(%arg0: i32, %arg1: i32) -> (i32, i32) {
    %c0_i32 = arith.constant 0 : i32
    %c0_i32_0 = arith.constant 0 : i32
    %c0_i32_1 = arith.constant 0 : i32
    return %c0_i32, %c0_i32_0 : i32, i32
  }
  func.func @transform_3(%arg0: i32, %arg1: i32) -> (i32, i32) {
    %c0_i32 = arith.constant 0 : i32
    %c0_i32_0 = arith.constant 0 : i32
    return %arg0, %c0_i32 : i32, i32
  }
}

</mosaic_0001>

<bundles_post_ra>
// kernel: esn_forward.1
= control target key start
LH: loop header
LB: loop body
LE: loop exit
PB: predicated region body
PF: predicated region fallthrough
CT: control target
= control target key end

     0   :  { %v2463_v0 = vmov 0.0|0.0   ;;  %vm2464_vm0 = vmmov 0   ;;  %v2465_v4 = vmov 0.0   ;;  %s2930_s2 = inlined_call_operand.vmem [shape: f32[128,128], index: 2, kind: input, shape index: {}]   ;;  %s2931_s1 = inlined_call_operand.vmem [shape: f32[128,128], index: 1, kind: input, shape index: {}]   ;;  %s2932_s0 = inlined_call_operand.vmem [shape: f32[8,8,128], index: 0, kind: input, shape index: {}]   ;;  %s2933_s3 = inlined_call_operand.vmem [shape: f32[8,128], index: 3, kind: output, shape index: {}]  }
   0x1   :  { %2044 = vmatprep.subr.bf16.mxu0 %v2463_v0  ;;  %v35_v1 = vld [vmem:[%s2930_s2] sm:$0xff]  ;;  %v36_v2 = vld [vmem:[%s2930_s2 + $0x8] sm:$0xff]  ;;  %v37_v3 = vld [vmem:[%s2930_s2 + $0x10] sm:$0xff]  ;;  %1516 = vmatprep.mubr.msk.f32.mxu0 %vm2464_vm0, %v2465_v4 }
   0x2   :  { %v2498_v5 = vpack.c.bf16 %v36_v2, %v35_v1  ;;  %v38_v6 = vld [vmem:[%s2930_s2 + $0x18] sm:$0xff]  ;;  %2092 = vmatprep.subr.bf16.mxu1 %v2463_v0  ;;  %1586 = vmatprep.mubr.msk.f32.mxu1 %vm2464_vm0, %v2465_v4  ;;  %v39_v8 = vld [vmem:[%s2930_s2 + $0x20] sm:$0xff]  ;;  %v40_v9 = vld [vmem:[%s2930_s2 + $0x28] sm:$0xff] }
   0x3   :  { %v2507_v7 = vpack.c.bf16 %v38_v6, %v37_v3  ;;  %v2519_v10 = vpack.c.bf16 %v40_v9, %v39_v8  ;;  %v41_v11 = vld [vmem:[%s2930_s2 + $0x30] sm:$0xff]  ;;  %v42_v12 = vld [vmem:[%s2930_s2 + $0x38] sm:$0xff]  ;;  %v43_v14 = vld [vmem:[%s2930_s2 + $0x40] sm:$0xff] }
   0x4   :  { %2046 = vmatpush3.bf16.msra.mxu0 %v2498_v5  ;;  %2094 = vmatpush3.bf16.msra.mxu1 %v2498_v5  ;;  %v2531_v13 = vpack.c.bf16 %v42_v12, %v41_v11  ;;  %v44_v15 = vld [vmem:[%s2930_s2 + $0x48] sm:$0xff]  ;;  %v45_v17 = vld [vmem:[%s2930_s2 + $0x50] sm:$0xff]  ;;  %v46_v18 = vld [vmem:[%s2930_s2 + $0x58] sm:$0xff] }
   0x5   :  { %2047 = vmatprep.subr.bf16.mxu0 %v2463_v0  ;;  %2095 = vmatprep.subr.bf16.mxu1 %v2463_v0  ;;  %v2543_v16 = vpack.c.bf16 %v44_v15, %v43_v14  ;;  %v2555_v19 = vpack.c.bf16 %v46_v18, %v45_v17  ;;  %v47_v20 = vld [vmem:[%s2930_s2 + $0x60] sm:$0xff]  ;;  %v48_v21 = vld [vmem:[%s2930_s2 + $0x68] sm:$0xff]  ;;  %v49_v23 = vld [vmem:[%s2930_s2 + $0x70] sm:$0xff] }
   0x6   :  { %v2567_v22 = vpack.c.bf16 %v48_v21, %v47_v20  ;;  %v50_v24 = vld [vmem:[%s2930_s2 + $0x78] sm:$0xff]  ;;  %v19_v26 = vld [vmem:[%s2931_s1] sm:$0xff]  ;;  %v20_v27 = vld [vmem:[%s2931_s1 + $0x8] sm:$0xff] }
   0x7   :  { %v2579_v25 = vpack.c.bf16 %v50_v24, %v49_v23  ;;  %v2591_v28 = vpack.c.bf16 %v20_v27, %v19_v26  ;;  %v21_v29 = vld [vmem:[%s2931_s1 + $0x10] sm:$0xff]  ;;  %v22_v30 = vld [vmem:[%s2931_s1 + $0x18] sm:$0xff]  ;;  %v23_v32 = vld [vmem:[%s2931_s1 + $0x20] sm:$0xff] }
   0x8   :  { %2049 = vmatpush3.bf16.msra.mxu0 %v2507_v7  ;;  %2097 = vmatpush3.bf16.msra.mxu1 %v2507_v7  ;;  %v2604_v31 = vpack.c.bf16 %v22_v30, %v21_v29  ;;  %v24_v33 = vld [vmem:[%s2931_s1 + $0x28] sm:$0xff]  ;;  %v25_v35 = vld [vmem:[%s2931_s1 + $0x30] sm:$0xff]  ;;  %v26_v36 = vld [vmem:[%s2931_s1 + $0x38] sm:$0xff] }
   0x9   :  { %2050 = vmatprep.subr.bf16.mxu0 %v2463_v0  ;;  %2098 = vmatprep.subr.bf16.mxu1 %v2463_v0  ;;  %v2616_v34 = vpack.c.bf16 %v24_v33, %v23_v32  ;;  %v2626_v37 = vpack.c.bf16 %v26_v36, %v25_v35  ;;  %v27_v38 = vld [vmem:[%s2931_s1 + $0x40] sm:$0xff]  ;;  %v28_v39 = vld [vmem:[%s2931_s1 + $0x48] sm:$0xff]  ;;  %v29_v41 = vld [vmem:[%s2931_s1 + $0x50] sm:$0xff] }
   0xa   :  { %v2636_v40 = vpack.c.bf16 %v28_v39, %v27_v38  ;;  %v30_v42 = vld [vmem:[%s2931_s1 + $0x58] sm:$0xff]  ;;  %v31_v44 = vld [vmem:[%s2931_s1 + $0x60] sm:$0xff]  ;;  %v32_v45 = vld [vmem:[%s2931_s1 + $0x68] sm:$0xff] }
   0xb   :  { %v2646_v43 = vpack.c.bf16 %v30_v42, %v29_v41  ;;  %v2656_v46 = vpack.c.bf16 %v32_v45, %v31_v44  ;;  %v33_v47 = vld [vmem:[%s2931_s1 + $0x70] sm:$0xff]  ;;  %v34_v48 = vld [vmem:[%s2931_s1 + $0x78] sm:$0xff]  ;;  %v52_v50 = vld [vmem:[%s2932_s0] sm:$0xff] }
   0xc   :  { %2052 = vmatpush3.bf16.msra.mxu0 %v2519_v10  ;;  %2100 = vmatpush3.bf16.msra.mxu1 %v2519_v10  ;;  %v2666_v49 = vpack.c.bf16 %v34_v48, %v33_v47  ;;  %v1205_v54 = vld [vmem:[%s2932_s0 + $0x8] sm:$0xff]  ;;  %v1206_v58 = vld [vmem:[%s2932_s0 + $0x10] sm:$0xff]  ;;  %v1207_v62 = vld [vmem:[%s2932_s0 + $0x18] sm:$0xff] }
   0xd   :  { %2053 = vmatprep.subr.bf16.mxu0 %v2463_v0  ;;  %2101 = vmatprep.subr.bf16.mxu1 %v2463_v0  ;;  %v1208_v3 = vld [vmem:[%s2932_s0 + $0x20] sm:$0xff]  ;;  %v1209_v11 = vld [vmem:[%s2932_s0 + $0x28] sm:$0xff]  ;;  %v1210_v12 = vld [vmem:[%s2932_s0 + $0x30] sm:$0xff] }
  0x10   :  { %2055 = vmatpush3.bf16.msra.mxu0 %v2531_v13  ;;  %2103 = vmatpush3.bf16.msra.mxu1 %v2531_v13 }
  0x11   :  { %2056 = vmatprep.subr.bf16.mxu0 %v2463_v0  ;;  %2104 = vmatprep.subr.bf16.mxu1 %v2463_v0 }
  0x14   :  { %2058 = vmatpush3.bf16.msra.mxu0 %v2543_v16  ;;  %2106 = vmatpush3.bf16.msra.mxu1 %v2543_v16 }
  0x15   :  { %2059 = vmatprep.subr.bf16.mxu0 %v2463_v0  ;;  %2107 = vmatprep.subr.bf16.mxu1 %v2463_v0 }
  0x18   :  { %2061 = vmatpush3.bf16.msra.mxu0 %v2555_v19  ;;  %2109 = vmatpush3.bf16.msra.mxu1 %v2555_v19 }
  0x19   :  { %2062 = vmatprep.subr.bf16.mxu0 %v2463_v0  ;;  %2110 = vmatprep.subr.bf16.mxu1 %v2463_v0 }
  0x1c   :  { %2064 = vmatpush3.bf16.msra.mxu0 %v2567_v22  ;;  %2112 = vmatpush3.bf16.msra.mxu1 %v2567_v22 }
  0x1d   :  { %2065 = vmatprep.subr.bf16.mxu0 %v2463_v0  ;;  %2113 = vmatprep.subr.bf16.mxu1 %v2463_v0 }
  0x20   :  { %2067 = vmatpush3.bf16.msra.mxu0 %v2579_v25  ;;  %2115 = vmatpush3.bf16.msra.mxu1 %v2579_v25 }
  0x21   :  { %2068 = vmatprep.subr.bf16.mxu0 %v2463_v0  ;;  %2116 = vmatprep.subr.bf16.mxu1 %v2463_v0 }
  0x23   :  { %1517 = vmatmul.mubr.f32.vlgmr.msra.gmra.mrb[0].mxu0 %v2465_v4 }
  0x24   :  { %2070 = vmatpush3.bf16.msra.mxu0 %v2591_v28  ;;  %1551 = vmatprep.mubr.msk.f32.mxu0 %vm2464_vm0, %v2465_v4 }
  0x25   :  { %2071 = vmatprep.subr.bf16.mxu0 %v2463_v0 }
  0x28   :  { %2073 = vmatpush3.bf16.msra.mxu0 %v2604_v31 }
  0x29   :  { %2074 = vmatprep.subr.bf16.mxu0 %v2463_v0 }
  0x2c   :  { %2076 = vmatpush3.bf16.msra.mxu0 %v2616_v34 }
  0x2d   :  { %2077 = vmatprep.subr.bf16.mxu0 %v2463_v0 }
  0x30   :  { %2079 = vmatpush3.bf16.msra.mxu0 %v2626_v37 }
  0x31   :  { %2080 = vmatprep.subr.bf16.mxu0 %v2463_v0 }
  0x34   :  { %2082 = vmatpush3.bf16.msra.mxu0 %v2636_v40 }
  0x35   :  { %2083 = vmatprep.subr.bf16.mxu0 %v2463_v0 }
  0x38   :  { %2085 = vmatpush3.bf16.msra.mxu0 %v2646_v43 }
  0x39   :  { %2086 = vmatprep.subr.bf16.mxu0 %v2463_v0 }
  0x3c   :  { %2088 = vmatpush3.bf16.msra.mxu0 %v2656_v46 }
  0x3d   :  { %2089 = vmatprep.subr.bf16.mxu0 %v2463_v0 }
  0x40   :  { %2091 = vmatpush3.bf16.msra.mxu0 %v2666_v49 }
  0x41   :  { %2140 = vmatprep.subr.bf16.mxu0 %v2463_v0 }
  0x43   :  { %1552 = vmatmul.mubr.f32.vlgmr.msra.gmra.mrb[0].mxu0 %v52_v50 }
  0x44   :  { %2142 = vmatpush3.bf16.msra.mxu0 %v2498_v5  ;;  %1656 = vmatprep.mubr.msk.f32.mxu0 %vm2464_vm0, %v2465_v4 }
  0x45   :  { %2143 = vmatprep.subr.bf16.mxu0 %v2463_v0 }
  0x48   :  { %2145 = vmatpush3.bf16.msra.mxu0 %v2507_v7 }
  0x49   :  { %2146 = vmatprep.subr.bf16.mxu0 %v2463_v0 }
  0x4c   :  { %2148 = vmatpush3.bf16.msra.mxu0 %v2519_v10 }
  0x4d   :  { %2149 = vmatprep.subr.bf16.mxu0 %v2463_v0 }
  0x50   :  { %2151 = vmatpush3.bf16.msra.mxu0 %v2531_v13 }
  0x51   :  { %2152 = vmatprep.subr.bf16.mxu0 %v2463_v0 }
  0x54   :  { %2154 = vmatpush3.bf16.msra.mxu0 %v2543_v16 }
  0x55   :  { %2155 = vmatprep.subr.bf16.mxu0 %v2463_v0 }
  0x58   :  { %2157 = vmatpush3.bf16.msra.mxu0 %v2555_v19 }
  0x59   :  { %2158 = vmatprep.subr.bf16.mxu0 %v2463_v0 }
  0x5c   :  { %2160 = vmatpush3.bf16.msra.mxu0 %v2567_v22 }
  0x5d   :  { %2161 = vmatprep.subr.bf16.mxu0 %v2463_v0 }
  0x60   :  { %2163 = vmatpush3.bf16.msra.mxu0 %v2579_v25 }
  0x61   :  { %2164 = vmatprep.subr.bf16.mxu0 %v2463_v0 }
 0x116   :  { %v189_v51 = vpop.f32.mrb[0].mxu0 }
 0x117   :  { %2447 = vtanh.f32 %v189_v51  ;;  %v1553_v52 = vpop.f32.mrb[1].mxu0 }
 0x121   :  { %v2448_v53 = vpop.eup %2447 }
 0x122   :  { %1587 = vmatmul.mubr.f32.vlgmr.msra.gmra.mrb[0].mxu1 %v2448_v53 }
 0x123   :  { %2118 = vmatpush3.bf16.msra.mxu1 %v2591_v28  ;;  %1621 = vmatprep.mubr.msk.f32.mxu1 %vm2464_vm0, %v2465_v4 }
 0x124   :  { %2119 = vmatprep.subr.bf16.mxu1 %v2463_v0 }
 0x127   :  { %2121 = vmatpush3.bf16.msra.mxu1 %v2604_v31 }
 0x128   :  { %2122 = vmatprep.subr.bf16.mxu1 %v2463_v0 }
 0x12b   :  { %2124 = vmatpush3.bf16.msra.mxu1 %v2616_v34 }
 0x12c   :  { %2125 = vmatprep.subr.bf16.mxu1 %v2463_v0 }
 0x12f   :  { %2127 = vmatpush3.bf16.msra.mxu1 %v2626_v37 }
 0x130   :  { %2128 = vmatprep.subr.bf16.mxu1 %v2463_v0 }
 0x133   :  { %2130 = vmatpush3.bf16.msra.mxu1 %v2636_v40 }
 0x134   :  { %2131 = vmatprep.subr.bf16.mxu1 %v2463_v0 }
 0x137   :  { %2133 = vmatpush3.bf16.msra.mxu1 %v2646_v43 }
 0x138   :  { %2134 = vmatprep.subr.bf16.mxu1 %v2463_v0 }
 0x13b   :  { %2136 = vmatpush3.bf16.msra.mxu1 %v2656_v46 }
 0x13c   :  { %2137 = vmatprep.subr.bf16.mxu1 %v2463_v0 }
 0x13f   :  { %2139 = vmatpush3.bf16.msra.mxu1 %v2666_v49 }
 0x140   :  { %2188 = vmatprep.subr.bf16.mxu1 %v2463_v0 }
 0x142   :  { %1622 = vmatmul.mubr.f32.vlgmr.msra.gmra.mrb[0].mxu1 %v1205_v54 }
 0x143   :  { %2190 = vmatpush3.bf16.msra.mxu1 %v2498_v5  ;;  %1726 = vmatprep.mubr.msk.f32.mxu1 %vm2464_vm0, %v2465_v4 }
 0x144   :  { %2191 = vmatprep.subr.bf16.mxu1 %v2463_v0 }
 0x147   :  { %2193 = vmatpush3.bf16.msra.mxu1 %v2507_v7 }
 0x148   :  { %2194 = vmatprep.subr.bf16.mxu1 %v2463_v0 }
 0x14b   :  { %2196 = vmatpush3.bf16.msra.mxu1 %v2519_v10 }
 0x14c   :  { %2197 = vmatprep.subr.bf16.mxu1 %v2463_v0 }
 0x14f   :  { %2199 = vmatpush3.bf16.msra.mxu1 %v2531_v13 }
 0x150   :  { %2200 = vmatprep.subr.bf16.mxu1 %v2463_v0 }
 0x153   :  { %2202 = vmatpush3.bf16.msra.mxu1 %v2543_v16 }
 0x154   :  { %2203 = vmatprep.subr.bf16.mxu1 %v2463_v0 }
 0x157   :  { %2205 = vmatpush3.bf16.msra.mxu1 %v2555_v19 }
 0x158   :  { %2206 = vmatprep.subr.bf16.mxu1 %v2463_v0 }
 0x15b   :  { %2208 = vmatpush3.bf16.msra.mxu1 %v2567_v22 }
 0x15c   :  { %2209 = vmatprep.subr.bf16.mxu1 %v2463_v0 }
 0x15f   :  { %2211 = vmatpush3.bf16.msra.mxu1 %v2579_v25 }
 0x160   :  { %2212 = vmatprep.subr.bf16.mxu1 %v2463_v0 }
 0x215   :  { %v332_v55 = vpop.f32.mrb[0].mxu1 }
 0x216   :  { %2449 = vtanh.f32 %v332_v55  ;;  %v1623_v56 = vpop.f32.mrb[1].mxu1 }
 0x220   :  { %v2450_v57 = vpop.eup %2449 }
 0x221   :  { %1657 = vmatmul.mubr.f32.vlgmr.msra.gmra.mrb[2].mxu0 %v2450_v57 }
 0x222   :  { %2166 = vmatpush3.bf16.msra.mxu0 %v2591_v28  ;;  %1691 = vmatprep.mubr.msk.f32.mxu0 %vm2464_vm0, %v2465_v4 }
 0x223   :  { %2167 = vmatprep.subr.bf16.mxu0 %v2463_v0 }
 0x226   :  { %2169 = vmatpush3.bf16.msra.mxu0 %v2604_v31 }
 0x227   :  { %2170 = vmatprep.subr.bf16.mxu0 %v2463_v0 }
 0x22a   :  { %2172 = vmatpush3.bf16.msra.mxu0 %v2616_v34 }
 0x22b   :  { %2173 = vmatprep.subr.bf16.mxu0 %v2463_v0 }
 0x22e   :  { %2175 = vmatpush3.bf16.msra.mxu0 %v2626_v37 }
 0x22f   :  { %2176 = vmatprep.subr.bf16.mxu0 %v2463_v0 }
 0x232   :  { %2178 = vmatpush3.bf16.msra.mxu0 %v2636_v40 }
 0x233   :  { %2179 = vmatprep.subr.bf16.mxu0 %v2463_v0 }
 0x236   :  { %2181 = vmatpush3.bf16.msra.mxu0 %v2646_v43 }
 0x237   :  { %2182 = vmatprep.subr.bf16.mxu0 %v2463_v0 }
 0x23a   :  { %2184 = vmatpush3.bf16.msra.mxu0 %v2656_v46 }
 0x23b   :  { %2185 = vmatprep.subr.bf16.mxu0 %v2463_v0 }
 0x23e   :  { %2187 = vmatpush3.bf16.msra.mxu0 %v2666_v49 }
 0x23f   :  { %2236 = vmatprep.subr.bf16.mxu0 %v2463_v0 }
 0x241   :  { %1692 = vmatmul.mubr.f32.vlgmr.msra.gmra.mrb[2].mxu0 %v1206_v58 }
 0x242   :  { %2238 = vmatpush3.bf16.msra.mxu0 %v2498_v5  ;;  %1796 = vmatprep.mubr.msk.f32.mxu0 %vm2464_vm0, %v2465_v4 }
 0x243   :  { %2239 = vmatprep.subr.bf16.mxu0 %v2463_v0 }
 0x246   :  { %2241 = vmatpush3.bf16.msra.mxu0 %v2507_v7 }
 0x247   :  { %2242 = vmatprep.subr.bf16.mxu0 %v2463_v0 }
 0x24a   :  { %2244 = vmatpush3.bf16.msra.mxu0 %v2519_v10 }
 0x24b   :  { %2245 = vmatprep.subr.bf16.mxu0 %v2463_v0 }
 0x24e   :  { %2247 = vmatpush3.bf16.msra.mxu0 %v2531_v13 }
 0x24f   :  { %2248 = vmatprep.subr.bf16.mxu0 %v2463_v0 }
 0x252   :  { %2250 = vmatpush3.bf16.msra.mxu0 %v2543_v16 }
 0x253   :  { %2251 = vmatprep.subr.bf16.mxu0 %v2463_v0 }
 0x256   :  { %2253 = vmatpush3.bf16.msra.mxu0 %v2555_v19 }
 0x257   :  { %2254 = vmatprep.subr.bf16.mxu0 %v2463_v0 }
 0x25a   :  { %2256 = vmatpush3.bf16.msra.mxu0 %v2567_v22 }
 0x25b   :  { %2257 = vmatprep.subr.bf16.mxu0 %v2463_v0 }
 0x25e   :  { %2259 = vmatpush3.bf16.msra.mxu0 %v2579_v25 }
 0x25f   :  { %2260 = vmatprep.subr.bf16.mxu0 %v2463_v0 }
 0x314   :  { %v475_v59 = vpop.f32.mrb[2].mxu0 }
 0x315   :  { %2451 = vtanh.f32 %v475_v59  ;;  %v1693_v60 = vpop.f32.mrb[3].mxu0 }
 0x31f   :  { %v2452_v61 = vpop.eup %2451 }
 0x320   :  { %1727 = vmatmul.mubr.f32.vlgmr.msra.gmra.mrb[2].mxu1 %v2452_v61 }
 0x321   :  { %2214 = vmatpush3.bf16.msra.mxu1 %v2591_v28  ;;  %1761 = vmatprep.mubr.msk.f32.mxu1 %vm2464_vm0, %v2465_v4 }
 0x322   :  { %2215 = vmatprep.subr.bf16.mxu1 %v2463_v0 }
 0x325   :  { %2217 = vmatpush3.bf16.msra.mxu1 %v2604_v31 }
 0x326   :  { %2218 = vmatprep.subr.bf16.mxu1 %v2463_v0 }
 0x329   :  { %2220 = vmatpush3.bf16.msra.mxu1 %v2616_v34 }
 0x32a   :  { %2221 = vmatprep.subr.bf16.mxu1 %v2463_v0 }
 0x32d   :  { %2223 = vmatpush3.bf16.msra.mxu1 %v2626_v37 }
 0x32e   :  { %2224 = vmatprep.subr.bf16.mxu1 %v2463_v0 }
 0x331   :  { %2226 = vmatpush3.bf16.msra.mxu1 %v2636_v40 }
 0x332   :  { %2227 = vmatprep.subr.bf16.mxu1 %v2463_v0 }
 0x335   :  { %2229 = vmatpush3.bf16.msra.mxu1 %v2646_v43 }
 0x336   :  { %2230 = vmatprep.subr.bf16.mxu1 %v2463_v0 }
 0x339   :  { %2232 = vmatpush3.bf16.msra.mxu1 %v2656_v46 }
 0x33a   :  { %2233 = vmatprep.subr.bf16.mxu1 %v2463_v0 }
 0x33d   :  { %2235 = vmatpush3.bf16.msra.mxu1 %v2666_v49 }
 0x33e   :  { %2284 = vmatprep.subr.bf16.mxu1 %v2463_v0 }
 0x340   :  { %1762 = vmatmul.mubr.f32.vlgmr.msra.gmra.mrb[2].mxu1 %v1207_v62 }
 0x341   :  { %2286 = vmatpush3.bf16.msra.mxu1 %v2498_v5  ;;  %1866 = vmatprep.mubr.msk.f32.mxu1 %vm2464_vm0, %v2465_v4 }
 0x342   :  { %2287 = vmatprep.subr.bf16.mxu1 %v2463_v0 }
 0x345   :  { %2289 = vmatpush3.bf16.msra.mxu1 %v2507_v7 }
 0x346   :  { %2290 = vmatprep.subr.bf16.mxu1 %v2463_v0 }
 0x349   :  { %2292 = vmatpush3.bf16.msra.mxu1 %v2519_v10 }
 0x34a   :  { %2293 = vmatprep.subr.bf16.mxu1 %v2463_v0 }
 0x34d   :  { %2295 = vmatpush3.bf16.msra.mxu1 %v2531_v13 }
 0x34e   :  { %2296 = vmatprep.subr.bf16.mxu1 %v2463_v0 }
 0x351   :  { %2298 = vmatpush3.bf16.msra.mxu1 %v2543_v16 }
 0x352   :  { %2299 = vmatprep.subr.bf16.mxu1 %v2463_v0 }
 0x355   :  { %2301 = vmatpush3.bf16.msra.mxu1 %v2555_v19 }
 0x356   :  { %2302 = vmatprep.subr.bf16.mxu1 %v2463_v0 }
 0x359   :  { %2304 = vmatpush3.bf16.msra.mxu1 %v2567_v22 }
 0x35a   :  { %2305 = vmatprep.subr.bf16.mxu1 %v2463_v0 }
 0x35d   :  { %2307 = vmatpush3.bf16.msra.mxu1 %v2579_v25 }
 0x35e   :  { %2308 = vmatprep.subr.bf16.mxu1 %v2463_v0 }
 0x413   :  { %v618_v63 = vpop.f32.mrb[2].mxu1 }
 0x414   :  { %2453 = vtanh.f32 %v618_v63  ;;  %v1763_v1 = vpop.f32.mrb[3].mxu1 }
 0x41e   :  { %v2454_v2 = vpop.eup %2453 }
 0x41f   :  { %1797 = vmatmul.mubr.f32.vlgmr.msra.gmra.mrb[4].mxu0 %v2454_v2 }
 0x420   :  { %2262 = vmatpush3.bf16.msra.mxu0 %v2591_v28  ;;  %1831 = vmatprep.mubr.msk.f32.mxu0 %vm2464_vm0, %v2465_v4 }
 0x421   :  { %2263 = vmatprep.subr.bf16.mxu0 %v2463_v0 }
 0x424   :  { %2265 = vmatpush3.bf16.msra.mxu0 %v2604_v31 }
 0x425   :  { %2266 = vmatprep.subr.bf16.mxu0 %v2463_v0 }
 0x428   :  { %2268 = vmatpush3.bf16.msra.mxu0 %v2616_v34 }
 0x429   :  { %2269 = vmatprep.subr.bf16.mxu0 %v2463_v0 }
 0x42c   :  { %2271 = vmatpush3.bf16.msra.mxu0 %v2626_v37 }
 0x42d   :  { %2272 = vmatprep.subr.bf16.mxu0 %v2463_v0 }
 0x430   :  { %2274 = vmatpush3.bf16.msra.mxu0 %v2636_v40 }
 0x431   :  { %2275 = vmatprep.subr.bf16.mxu0 %v2463_v0 }
 0x434   :  { %2277 = vmatpush3.bf16.msra.mxu0 %v2646_v43 }
 0x435   :  { %2278 = vmatprep.subr.bf16.mxu0 %v2463_v0 }
 0x438   :  { %2280 = vmatpush3.bf16.msra.mxu0 %v2656_v46 }
 0x439   :  { %2281 = vmatprep.subr.bf16.mxu0 %v2463_v0 }
 0x43c   :  { %2283 = vmatpush3.bf16.msra.mxu0 %v2666_v49 }
 0x43d   :  { %2332 = vmatprep.subr.bf16.mxu0 %v2463_v0 }
 0x43f   :  { %1832 = vmatmul.mubr.f32.vlgmr.msra.gmra.mrb[4].mxu0 %v1208_v3 }
 0x440   :  { %2334 = vmatpush3.bf16.msra.mxu0 %v2498_v5  ;;  %1936 = vmatprep.mubr.msk.f32.mxu0 %vm2464_vm0, %v2465_v4 }
 0x441   :  { %2335 = vmatprep.subr.bf16.mxu0 %v2463_v0 }
 0x444   :  { %2337 = vmatpush3.bf16.msra.mxu0 %v2507_v7 }
 0x445   :  { %2338 = vmatprep.subr.bf16.mxu0 %v2463_v0 }
 0x448   :  { %2340 = vmatpush3.bf16.msra.mxu0 %v2519_v10 }
 0x449   :  { %2341 = vmatprep.subr.bf16.mxu0 %v2463_v0 }
 0x44c   :  { %2343 = vmatpush3.bf16.msra.mxu0 %v2531_v13 }
 0x44d   :  { %2344 = vmatprep.subr.bf16.mxu0 %v2463_v0 }
 0x450   :  { %2346 = vmatpush3.bf16.msra.mxu0 %v2543_v16 }
 0x451   :  { %2347 = vmatprep.subr.bf16.mxu0 %v2463_v0 }
 0x454   :  { %2349 = vmatpush3.bf16.msra.mxu0 %v2555_v19 }
 0x455   :  { %2350 = vmatprep.subr.bf16.mxu0 %v2463_v0 }
 0x458   :  { %2352 = vmatpush3.bf16.msra.mxu0 %v2567_v22 }
 0x459   :  { %2353 = vmatprep.subr.bf16.mxu0 %v2463_v0 }
 0x45c   :  { %2355 = vmatpush3.bf16.msra.mxu0 %v2579_v25 }
 0x45d   :  { %2356 = vmatprep.subr.bf16.mxu0 %v2463_v0 }
 0x512   :  { %v761_v6 = vpop.f32.mrb[4].mxu0 }
 0x513   :  { %2455 = vtanh.f32 %v761_v6  ;;  %v1833_v8 = vpop.f32.mrb[5].mxu0 }
 0x51d   :  { %v2456_v9 = vpop.eup %2455 }
 0x51e   :  { %1867 = vmatmul.mubr.f32.vlgmr.msra.gmra.mrb[4].mxu1 %v2456_v9 }
 0x51f   :  { %2310 = vmatpush3.bf16.msra.mxu1 %v2591_v28  ;;  %1901 = vmatprep.mubr.msk.f32.mxu1 %vm2464_vm0, %v2465_v4 }
 0x520   :  { %2311 = vmatprep.subr.bf16.mxu1 %v2463_v0 }
 0x523   :  { %2313 = vmatpush3.bf16.msra.mxu1 %v2604_v31 }
 0x524   :  { %2314 = vmatprep.subr.bf16.mxu1 %v2463_v0 }
 0x527   :  { %2316 = vmatpush3.bf16.msra.mxu1 %v2616_v34 }
 0x528   :  { %2317 = vmatprep.subr.bf16.mxu1 %v2463_v0 }
 0x52b   :  { %2319 = vmatpush3.bf16.msra.mxu1 %v2626_v37 }
 0x52c   :  { %2320 = vmatprep.subr.bf16.mxu1 %v2463_v0 }
 0x52f   :  { %2322 = vmatpush3.bf16.msra.mxu1 %v2636_v40 }
 0x530   :  { %2323 = vmatprep.subr.bf16.mxu1 %v2463_v0 }
 0x533   :  { %2325 = vmatpush3.bf16.msra.mxu1 %v2646_v43 }
 0x534   :  { %2326 = vmatprep.subr.bf16.mxu1 %v2463_v0 }
 0x537   :  { %2328 = vmatpush3.bf16.msra.mxu1 %v2656_v46 }
 0x538   :  { %2329 = vmatprep.subr.bf16.mxu1 %v2463_v0 }
 0x53b   :  { %2331 = vmatpush3.bf16.msra.mxu1 %v2666_v49 }
 0x53c   :  { %2380 = vmatprep.subr.bf16.mxu1 %v2463_v0 }
 0x53e   :  { %1902 = vmatmul.mubr.f32.vlgmr.msra.gmra.mrb[4].mxu1 %v1209_v11 }
 0x53f   :  { %2382 = vmatpush3.bf16.msra.mxu1 %v2498_v5  ;;  %2006 = vmatprep.mubr.msk.f32.mxu1 %vm2464_vm0, %v2465_v4 }
 0x540   :  { %2383 = vmatprep.subr.bf16.mxu1 %v2463_v0 }
 0x543   :  { %2385 = vmatpush3.bf16.msra.mxu1 %v2507_v7 }
 0x544   :  { %2386 = vmatprep.subr.bf16.mxu1 %v2463_v0 }
 0x547   :  { %2388 = vmatpush3.bf16.msra.mxu1 %v2519_v10 }
 0x548   :  { %2389 = vmatprep.subr.bf16.mxu1 %v2463_v0 }
 0x54b   :  { %2391 = vmatpush3.bf16.msra.mxu1 %v2531_v13 }
 0x54c   :  { %2392 = vmatprep.subr.bf16.mxu1 %v2463_v0 }
 0x54f   :  { %2394 = vmatpush3.bf16.msra.mxu1 %v2543_v16 }
 0x550   :  { %2395 = vmatprep.subr.bf16.mxu1 %v2463_v0 }
 0x553   :  { %2397 = vmatpush3.bf16.msra.mxu1 %v2555_v19 }
 0x554   :  { %2398 = vmatprep.subr.bf16.mxu1 %v2463_v0 }
 0x557   :  { %2400 = vmatpush3.bf16.msra.mxu1 %v2567_v22 }
 0x558   :  { %2401 = vmatprep.subr.bf16.mxu1 %v2463_v0 }
 0x55b   :  { %2403 = vmatpush3.bf16.msra.mxu1 %v2579_v25 }
 0x55c   :  { %2404 = vmatprep.subr.bf16.mxu1 %v2463_v0 }
 0x611   :  { %v904_v5 = vpop.f32.mrb[4].mxu1 }
 0x612   :  { %2457 = vtanh.f32 %v904_v5  ;;  %v1903_v7 = vpop.f32.mrb[5].mxu1 }
 0x61c   :  { %v2458_v10 = vpop.eup %2457 }
 0x61d   :  { %1937 = vmatmul.mubr.f32.vlgmr.msra.gmra.mrb[6].mxu0 %v2458_v10 }
 0x61e   :  { %2358 = vmatpush3.bf16.msra.mxu0 %v2591_v28  ;;  %1971 = vmatprep.mubr.msk.f32.mxu0 %vm2464_vm0, %v2465_v4 }
 0x61f   :  { %2359 = vmatprep.subr.bf16.mxu0 %v2463_v0 }
 0x622   :  { %2361 = vmatpush3.bf16.msra.mxu0 %v2604_v31 }
 0x623   :  { %2362 = vmatprep.subr.bf16.mxu0 %v2463_v0 }
 0x626   :  { %2364 = vmatpush3.bf16.msra.mxu0 %v2616_v34 }
 0x627   :  { %2365 = vmatprep.subr.bf16.mxu0 %v2463_v0 }
 0x62a   :  { %2367 = vmatpush3.bf16.msra.mxu0 %v2626_v37 }
 0x62b   :  { %2368 = vmatprep.subr.bf16.mxu0 %v2463_v0 }
 0x62e   :  { %2370 = vmatpush3.bf16.msra.mxu0 %v2636_v40 }
 0x62f   :  { %2371 = vmatprep.subr.bf16.mxu0 %v2463_v0 }
 0x632   :  { %2373 = vmatpush3.bf16.msra.mxu0 %v2646_v43 }
 0x633   :  { %2374 = vmatprep.subr.bf16.mxu0 %v2463_v0 }
 0x636   :  { %2376 = vmatpush3.bf16.msra.mxu0 %v2656_v46 }
 0x637   :  { %2377 = vmatprep.subr.bf16.mxu0 %v2463_v0 }
 0x63a   :  { %2379 = vmatpush3.bf16.msra.mxu0 %v2666_v49 }
 0x63d   :  { %1972 = vmatmul.mubr.f32.vlgmr.msra.gmra.mrb[6].mxu0 %v1210_v12 }
 0x710   :  { %v1047_v13 = vpop.f32.mrb[6].mxu0 }
 0x711   :  { %2459 = vtanh.f32 %v1047_v13  ;;  %v1973_v14 = vpop.f32.mrb[7].mxu0 }
 0x71b   :  { %v2460_v15 = vpop.eup %2459 }
 0x71c   :  { %2007 = vmatmul.mubr.f32.vlgmr.msra.gmra.mrb[6].mxu1 %v2460_v15 }
 0x71d   :  { %2406 = vmatpush3.bf16.msra.mxu1 %v2591_v28  ;;  %2041 = vmatprep.mubr.msk.f32.mxu1 %vm2464_vm0, %v2465_v4  ;;  %v1211_v4 = vld [vmem:[%s2932_s0 + $0x38] sm:$0xff] }
 0x71e   :  { %2407 = vmatprep.subr.bf16.mxu1 %v2463_v0 }
 0x721   :  { %2409 = vmatpush3.bf16.msra.mxu1 %v2604_v31 }
 0x722   :  { %2410 = vmatprep.subr.bf16.mxu1 %v2463_v0 }
 0x725   :  { %2412 = vmatpush3.bf16.msra.mxu1 %v2616_v34 }
 0x726   :  { %2413 = vmatprep.subr.bf16.mxu1 %v2463_v0 }
 0x729   :  { %2415 = vmatpush3.bf16.msra.mxu1 %v2626_v37 }
 0x72a   :  { %2416 = vmatprep.subr.bf16.mxu1 %v2463_v0 }
 0x72d   :  { %2418 = vmatpush3.bf16.msra.mxu1 %v2636_v40 }
 0x72e   :  { %2419 = vmatprep.subr.bf16.mxu1 %v2463_v0 }
 0x731   :  { %2421 = vmatpush3.bf16.msra.mxu1 %v2646_v43 }
 0x732   :  { %2422 = vmatprep.subr.bf16.mxu1 %v2463_v0 }
 0x735   :  { %2424 = vmatpush3.bf16.msra.mxu1 %v2656_v46 }
 0x736   :  { %2425 = vmatprep.subr.bf16.mxu1 %v2463_v0 }
 0x739   :  { %2427 = vmatpush3.bf16.msra.mxu1 %v2666_v49 }
 0x73c   :  { %2042 = vmatmul.mubr.f32.vlgmr.msra.gmra.mrb[6].mxu1 %v1211_v4 }
 0x80f   :  { %v1190_v16 = vpop.f32.mrb[6].mxu1 }
 0x810   :  { %2461 = vtanh.f32 %v1190_v16  ;;  %v2043_v17 = vpop.f32.mrb[7].mxu1 }
 0x81a   :  { %v2462_v18 = vpop.eup %2461 }
 0x81b   :  { %1200 = vst [vmem:[%s2933_s3] sm:$0xff] %v2462_v18 }

</bundles_post_ra>
